<compile_context>
chip_gen: v7x
topology: tpu7x:2x2x1
jax: 0.10.0
libtpu: 0.0.40
codegen_flags: <defaults>
</compile_context>

<pallas_src>
import functools

import jax
import jax.numpy as jnp
import numpy as np
from jax.experimental import pallas as pl
from jax.experimental.pallas import tpu as pltpu


def _relu6(x):
    return jnp.minimum(jnp.maximum(x, 0.0), 6.0)


def _inverted_residual_kernel(x_ref, w1_ref, wdw_ref, w2_ref, o_ref, *, wp):
    """One image per grid step, channel-major / lane-dense layout.

    x_ref  : (1, Cin, Ppad)   reflection-padded input, spatial flattened on lanes
    w1_ref : (hidden, Cin)    1x1 expansion weights   (== torch w1[:, :, 0, 0])
    wdw_ref: (hidden, 9)      3x3 depthwise weights, taps on lanes
    w2_ref : (Cout, hidden)   1x1 projection weights  (== torch w2[:, :, 0, 0])
    o_ref  : (1, Cout, Ppad)  output on the padded spatial grid (wrapper crops)
    """
    x = x_ref[0]                                     # (Cin, Ppad)
    ppad = x.shape[-1]

    # ---- 1x1 expansion conv + ReLU6 : 2-D matmul (hidden, Cin) @ (Cin, Ppad) ----
    h = jnp.dot(w1_ref[...], x, preferred_element_type=jnp.float32)   # (hidden, Ppad)
    h = _relu6(h)

    # ---- depthwise 3x3 : 9 lane-rolled multiply-adds (VPU + XLU) + ReLU6 ----
    # Each tap weight is a per-channel (per-sublane) scalar column (hidden, 1).
    wdw = wdw_ref[...]                               # (hidden, 9)
    acc = h * wdw[:, 4:5]                            # center tap (di=1, dj=1), shift 0
    for di in range(3):
        for dj in range(3):
            s = (di - 1) * wp + (dj - 1)             # flat offset of this tap
            if s == 0:
                continue
            tap = pltpu.roll(h, (-s) % ppad, axis=1)  # tap[p] == h[p + s] for interior p
            acc = acc + tap * wdw[:, 3 * di + dj:3 * di + dj + 1]
    acc = _relu6(acc)

    # ---- 1x1 projection conv : (Cout, hidden) @ (hidden, Ppad) ----
    out = jnp.dot(w2_ref[...], acc, preferred_element_type=jnp.float32)  # (Cout, Ppad)
    o_ref[0] = out.astype(o_ref.dtype)


def inverted_residual_block(x, w1, wdw, w2):
    """InvertedResidualBlock forward.

    x   : (N, Cin, H, W) float32, NCHW (same layout as the PyTorch module)
    w1  : (hidden, Cin)   == torch conv1.weight[:, :, 0, 0]
    wdw : (hidden, 9)     == torch dwconv.weight[:, 0, :, :].reshape(hidden, 9)
    w2  : (Cout, hidden)  == torch conv2.weight[:, :, 0, 0]
    """
    N, Cin, H, W = x.shape
    assert H >= 2 and W >= 2, "ReflectionPad2d(1) requires H >= 2 and W >= 2"
    hidden = w1.shape[0]
    Cout = w2.shape[0]
    Hp, Wp = H + 2, W + 2
    P = Hp * Wp
    Ppad = ((P + 127) // 128) * 128          # lane-align the flattened spatial axis

    # ReflectionPad2d(1) commutes with the pointwise 1x1 conv + ReLU6, so pad
    # the *input* here; the kernel computes on the padded grid and the valid
    # (H, W) interior is cropped afterwards.
    xp = jnp.pad(x, ((0, 0), (0, 0), (1, 1), (1, 1)), mode="reflect")   # (N,Cin,Hp,Wp)
    xf = xp.reshape(N, Cin, P)
    if Ppad != P:
        xf = jnp.pad(xf, ((0, 0), (0, 0), (0, Ppad - P)))               # (N,Cin,Ppad)

    flops = 2 * N * Ppad * (Cin * hidden + 9 * hidden + hidden * Cout)
    bytes_accessed = 4 * (xf.size + N * Cout * Ppad + w1.size + wdw.size + w2.size)

    out_flat = pl.pallas_call(
        functools.partial(_inverted_residual_kernel, wp=Wp),
        out_shape=jax.ShapeDtypeStruct((N, Cout, Ppad), jnp.float32),
        grid_spec=pltpu.PrefetchScalarGridSpec(
            num_scalar_prefetch=0,
            grid=(N,),                       # >=2 parallel steps -> both TCs on v7x
            in_specs=[
                pl.BlockSpec((1, Cin, Ppad), lambda b: (b, 0, 0)),
                pl.BlockSpec((hidden, Cin), lambda b: (0, 0)),
                pl.BlockSpec((hidden, 9), lambda b: (0, 0)),
                pl.BlockSpec((Cout, hidden), lambda b: (0, 0)),
            ],
            out_specs=pl.BlockSpec((1, Cout, Ppad), lambda b: (b, 0, 0)),
        ),
        compiler_params=pltpu.CompilerParams(
            dimension_semantics=("parallel",)),
        cost_estimate=pl.CostEstimate(
            flops=flops, transcendentals=0, bytes_accessed=bytes_accessed),
    )(xf, w1, wdw, w2)

    # Crop the padded grid back to the valid (H, W) interior.
    out = out_flat[:, :, :P].reshape(N, Cout, Hp, Wp)[:, :, 1:H + 1, 1:W + 1]
    return out


def reference(x, w1, wdw, w2):
    """Pure-JAX NCHW reference matching the PyTorch module semantics."""
    N, Cin, H, W = x.shape
    h = jnp.einsum("oc,nchw->nohw", w1, x)
    h = jnp.clip(h, 0.0, 6.0)
    hp = jnp.pad(h, ((0, 0), (0, 0), (1, 1), (1, 1)), mode="reflect")
    acc = jnp.zeros_like(h)
    for di in range(3):
        for dj in range(3):
            acc = acc + (hp[:, :, di:di + H, dj:dj + W]
                         * wdw[:, 3 * di + dj][None, :, None, None])
    acc = jnp.clip(acc, 0.0, 6.0)
    return jnp.einsum("oc,nchw->nohw", w2, acc)


if __name__ == "__main__":
    # Small shapes consistent with the module: inp=4, oup=4, expand_ratio=2.
    N, H, W = 2, 16, 16
    inp, oup, expand_ratio = 4, 4, 2
    hidden = int(inp * expand_ratio)

    key = jax.random.PRNGKey(0)
    kx, k1, kd, k2 = jax.random.split(key, 4)
    x = jax.random.normal(kx, (N, inp, H, W), dtype=jnp.float32)
    w1 = jax.random.normal(k1, (hidden, inp), dtype=jnp.float32) * 0.2
    wdw = jax.random.normal(kd, (hidden, 9), dtype=jnp.float32) * 0.2
    w2 = jax.random.normal(k2, (oup, hidden), dtype=jnp.float32) * 0.2

    out = jax.block_until_ready(inverted_residual_block(x, w1, wdw, w2))
    ref = jax.block_until_ready(reference(x, w1, wdw, w2))
    np.testing.assert_allclose(np.asarray(out), np.asarray(ref),
                               rtol=1e-4, atol=1e-4)
    print("KERNEL_OK")
</pallas_src>

<mosaic_0001>
module attributes {stable_mosaic.version = 11 : i64} {
  func.func @_inverted_residual_kernel(%arg0: i32, %arg1: memref<1x4x384xf32, #tpu.memory_space<vmem>>, %arg2: memref<8x4xf32, #tpu.memory_space<vmem>>, %arg3: memref<8x9xf32, #tpu.memory_space<vmem>>, %arg4: memref<4x8xf32, #tpu.memory_space<vmem>>, %arg5: memref<1x4x384xf32, #tpu.memory_space<vmem>>) attributes {dimension_semantics = [#tpu.dimension_semantics<parallel>], iteration_bounds = array<i64: 2>, scalar_prefetch = 0 : i64, scratch_operands = 0 : i64, tpu.core_type = #tpu.core_type<tc>, window_params = [{transform_indices = @transform_0, window_bounds = array<i64: 1, 4, 384>}, {pipeline_mode = #tpu.pipeline_mode<synchronous>, transform_indices = @transform_1, window_bounds = array<i64: 8, 4>}, {pipeline_mode = #tpu.pipeline_mode<synchronous>, transform_indices = @transform_2, window_bounds = array<i64: 8, 9>}, {pipeline_mode = #tpu.pipeline_mode<synchronous>, transform_indices = @transform_3, window_bounds = array<i64: 4, 8>}, {transform_indices = @transform_4, window_bounds = array<i64: 1, 4, 384>}]} {
    %c0 = arith.constant 0 : index
    %c0_0 = arith.constant 0 : index
    %c0_1 = arith.constant 0 : index
    %0 = vector.load %arg1[%c0, %c0_0, %c0_1] : memref<1x4x384xf32, #tpu.memory_space<vmem>>, vector<1x4x384xf32>
    %1 = vector.shape_cast %0 : vector<1x4x384xf32> to vector<4x384xf32>
    %c0_2 = arith.constant 0 : index
    %c0_3 = arith.constant 0 : index
    %2 = vector.load %arg2[%c0_2, %c0_3] : memref<8x4xf32, #tpu.memory_space<vmem>>, vector<8x4xf32>
    %cst = arith.constant dense<0.000000e+00> : vector<8x384xf32>
    %3 = tpu.matmul %2, %1, %cst {dimension_numbers = #tpu.dot_dimension_numbers<[1], [0], [0], [1], [0, 0, 1, 1], [], []>} : vector<8x4xf32>, vector<4x384xf32>, vector<8x384xf32> -> vector<8x384xf32>
    %cst_4 = arith.constant 0.000000e+00 : f32
    %4 = vector.broadcast %cst_4 : f32 to vector<8x384xf32>
    %5 = arith.maximumf %3, %4 : vector<8x384xf32>
    %cst_5 = arith.constant 6.000000e+00 : f32
    %6 = vector.broadcast %cst_5 : f32 to vector<8x384xf32>
    %7 = arith.minimumf %5, %6 : vector<8x384xf32>
    %c0_6 = arith.constant 0 : index
    %c0_7 = arith.constant 0 : index
    %8 = vector.load %arg3[%c0_6, %c0_7] : memref<8x9xf32, #tpu.memory_space<vmem>>, vector<8x9xf32>
    %9 = vector.extract_strided_slice %8 {offsets = [0, 4], sizes = [8, 1], strides = [1, 1]} : vector<8x9xf32> to vector<8x1xf32>
    %10 = vector.broadcast %9 : vector<8x1xf32> to vector<8x384xf32>
    %11 = arith.mulf %7, %10 : vector<8x384xf32>
    %c19_i32 = arith.constant 19 : i32
    %12 = tpu.dynamic_rotate %7 by %c19_i32 dim 1 : vector<8x384xf32>, i32 -> vector<8x384xf32>
    %13 = vector.extract_strided_slice %8 {offsets = [0, 0], sizes = [8, 1], strides = [1, 1]} : vector<8x9xf32> to vector<8x1xf32>
    %14 = vector.broadcast %13 : vector<8x1xf32> to vector<8x384xf32>
    %15 = arith.mulf %12, %14 : vector<8x384xf32>
    %16 = arith.addf %11, %15 : vector<8x384xf32>
    %c18_i32 = arith.constant 18 : i32
    %17 = tpu.dynamic_rotate %7 by %c18_i32 dim 1 : vector<8x384xf32>, i32 -> vector<8x384xf32>
    %18 = vector.extract_strided_slice %8 {offsets = [0, 1], sizes = [8, 1], strides = [1, 1]} : vector<8x9xf32> to vector<8x1xf32>
    %19 = vector.broadcast %18 : vector<8x1xf32> to vector<8x384xf32>
    %20 = arith.mulf %17, %19 : vector<8x384xf32>
    %21 = arith.addf %16, %20 : vector<8x384xf32>
    %c17_i32 = arith.constant 17 : i32
    %22 = tpu.dynamic_rotate %7 by %c17_i32 dim 1 : vector<8x384xf32>, i32 -> vector<8x384xf32>
    %23 = vector.extract_strided_slice %8 {offsets = [0, 2], sizes = [8, 1], strides = [1, 1]} : vector<8x9xf32> to vector<8x1xf32>
    %24 = vector.broadcast %23 : vector<8x1xf32> to vector<8x384xf32>
    %25 = arith.mulf %22, %24 : vector<8x384xf32>
    %26 = arith.addf %21, %25 : vector<8x384xf32>
    %c1_i32 = arith.constant 1 : i32
    %27 = tpu.dynamic_rotate %7 by %c1_i32 dim 1 : vector<8x384xf32>, i32 -> vector<8x384xf32>
    %28 = vector.extract_strided_slice %8 {offsets = [0, 3], sizes = [8, 1], strides = [1, 1]} : vector<8x9xf32> to vector<8x1xf32>
    %29 = vector.broadcast %28 : vector<8x1xf32> to vector<8x384xf32>
    %30 = arith.mulf %27, %29 : vector<8x384xf32>
    %31 = arith.addf %26, %30 : vector<8x384xf32>
    %c383_i32 = arith.constant 383 : i32
    %32 = tpu.dynamic_rotate %7 by %c383_i32 dim 1 : vector<8x384xf32>, i32 -> vector<8x384xf32>
    %33 = vector.extract_strided_slice %8 {offsets = [0, 5], sizes = [8, 1], strides = [1, 1]} : vector<8x9xf32> to vector<8x1xf32>
    %34 = vector.broadcast %33 : vector<8x1xf32> to vector<8x384xf32>
    %35 = arith.mulf %32, %34 : vector<8x384xf32>
    %36 = arith.addf %31, %35 : vector<8x384xf32>
    %c367_i32 = arith.constant 367 : i32
    %37 = tpu.dynamic_rotate %7 by %c367_i32 dim 1 : vector<8x384xf32>, i32 -> vector<8x384xf32>
    %38 = vector.extract_strided_slice %8 {offsets = [0, 6], sizes = [8, 1], strides = [1, 1]} : vector<8x9xf32> to vector<8x1xf32>
    %39 = vector.broadcast %38 : vector<8x1xf32> to vector<8x384xf32>
    %40 = arith.mulf %37, %39 : vector<8x384xf32>
    %41 = arith.addf %36, %40 : vector<8x384xf32>
    %c366_i32 = arith.constant 366 : i32
    %42 = tpu.dynamic_rotate %7 by %c366_i32 dim 1 : vector<8x384xf32>, i32 -> vector<8x384xf32>
    %43 = vector.extract_strided_slice %8 {offsets = [0, 7], sizes = [8, 1], strides = [1, 1]} : vector<8x9xf32> to vector<8x1xf32>
    %44 = vector.broadcast %43 : vector<8x1xf32> to vector<8x384xf32>
    %45 = arith.mulf %42, %44 : vector<8x384xf32>
    %46 = arith.addf %41, %45 : vector<8x384xf32>
    %c365_i32 = arith.constant 365 : i32
    %47 = tpu.dynamic_rotate %7 by %c365_i32 dim 1 : vector<8x384xf32>, i32 -> vector<8x384xf32>
    %48 = vector.extract_strided_slice %8 {offsets = [0, 8], sizes = [8, 1], strides = [1, 1]} : vector<8x9xf32> to vector<8x1xf32>
    %49 = vector.broadcast %48 : vector<8x1xf32> to vector<8x384xf32>
    %50 = arith.mulf %47, %49 : vector<8x384xf32>
    %51 = arith.addf %46, %50 : vector<8x384xf32>
    %cst_8 = arith.constant 0.000000e+00 : f32
    %52 = vector.broadcast %cst_8 : f32 to vector<8x384xf32>
    %53 = arith.maximumf %51, %52 : vector<8x384xf32>
    %cst_9 = arith.constant 6.000000e+00 : f32
    %54 = vector.broadcast %cst_9 : f32 to vector<8x384xf32>
    %55 = arith.minimumf %53, %54 : vector<8x384xf32>
    %c0_10 = arith.constant 0 : index
    %c0_11 = arith.constant 0 : index
    %56 = vector.load %arg4[%c0_10, %c0_11] : memref<4x8xf32, #tpu.memory_space<vmem>>, vector<4x8xf32>
    %cst_12 = arith.constant dense<0.000000e+00> : vector<4x384xf32>
    %57 = tpu.matmul %56, %55, %cst_12 {dimension_numbers = #tpu.dot_dimension_numbers<[1], [0], [0], [1], [0, 0, 1, 1], [], []>} : vector<4x8xf32>, vector<8x384xf32>, vector<4x384xf32> -> vector<4x384xf32>
    %c0_13 = arith.constant 0 : index
    %c0_14 = arith.constant 0 : index
    %c0_15 = arith.constant 0 : index
    %58 = vector.load %arg5[%c0_13, %c0_14, %c0_15] : memref<1x4x384xf32, #tpu.memory_space<vmem>>, vector<1x4x384xf32>
    %59 = vector.shape_cast %58 : vector<1x4x384xf32> to vector<4x384xf32>
    %60 = vector.shape_cast %57 : vector<4x384xf32> to vector<1x4x384xf32>
    tpu.vector_store %arg5[%c0_13, %c0_14, %c0_15], %60 {strides = array<i32>} : memref<1x4x384xf32, #tpu.memory_space<vmem>>, vector<1x4x384xf32>,
    return
  }
  func.func @transform_0(%arg0: i32) -> (i32, i32, i32) {
    %c0_i32 = arith.constant 0 : i32
    %c0_i32_0 = arith.constant 0 : i32
    %c0_i32_1 = arith.constant 0 : i32
    return %arg0, %c0_i32, %c0_i32_0 : i32, i32, i32
  }
  func.func @transform_1(%arg0: i32) -> (i32, i32) {
    %c0_i32 = arith.constant 0 : i32
    %c0_i32_0 = arith.constant 0 : i32
    %c0_i32_1 = arith.constant 0 : i32
    return %c0_i32, %c0_i32_0 : i32, i32
  }
  func.func @transform_2(%arg0: i32) -> (i32, i32) {
    %c0_i32 = arith.constant 0 : i32
    %c0_i32_0 = arith.constant 0 : i32
    %c0_i32_1 = arith.constant 0 : i32
    return %c0_i32, %c0_i32_0 : i32, i32
  }
  func.func @transform_3(%arg0: i32) -> (i32, i32) {
    %c0_i32 = arith.constant 0 : i32
    %c0_i32_0 = arith.constant 0 : i32
    %c0_i32_1 = arith.constant 0 : i32
    return %c0_i32, %c0_i32_0 : i32, i32
  }
  func.func @transform_4(%arg0: i32) -> (i32, i32, i32) {
    %c0_i32 = arith.constant 0 : i32
    %c0_i32_0 = arith.constant 0 : i32
    %c0_i32_1 = arith.constant 0 : i32
    return %arg0, %c0_i32, %c0_i32_0 : i32, i32, i32
  }
}

</mosaic_0001>

<bundles_post_ra>
// kernel: tpu_custom_call.1
= control target key start
LH: loop header
LB: loop body
LE: loop exit
PB: predicated region body
PF: predicated region fallthrough
CT: control target
= control target key end

     0   :  { %9 = vsyncpa [#allocation3], 0  ;;  %s1349_s0 = inlined_call_operand.hbm [shape: f32[2,4,384], index: 0, kind: input, shape index: {}]   ;;  %s1350_s1 = inlined_call_operand.vmem [shape: f32[8,4], index: 1, kind: input, shape index: {}]   ;;  %s1351_s2 = inlined_call_operand.vmem [shape: f32[8,9], index: 2, kind: input, shape index: {}]   ;;  %s1352_s3 = inlined_call_operand.vmem [shape: f32[4,8], index: 3, kind: input, shape index: {}]   ;;  %s1353_s4 = inlined_call_operand.hbm [shape: f32[2,4,384], index: 4, kind: output, shape index: {}]  }
   0x1   :  { %11 = vsyncpa [#allocation3 + $0x1], 0 }
   0x2   :  { %12 = vsyncpa [#allocation4], 0 }
   0x3   :  { %14 = vsyncpa [#allocation4 + $0x1], 0  ;;  %s1045_s15 = smov 0   ;;  %s1047_s16 = smov 0  }
   0x4   :  { %s1049_s17 = smov 0   ;;  %s1051_s18 = smov 0  }
   0x5 LB: > { %s1066_s19 = sadd.s32 4294967295, %s997_s18   ;;  %s792_s20 = sadd.s32 4294967294, %s997_s18   ;;  %s997_s18 = sphi %s1051_s18, %s1367_s18   ;;  %s993_s17 = sphi %s1049_s17, %s1366_s17   ;;  %s989_s16 = sphi %s1047_s16, %s1365_s16   ;;  %s985_s15 = sphi %s1045_s15, %s1364_s15  }
   0x6   : > { %s1070_s21 = sadd.s32 1, %s997_s18   ;;  %s27_s22 = sadd.s32 1, %s993_s17 }
   0x7   : > { %s24_s23 = ssub.s32 %s997_s18, %s1070_s21  ;;  %p34_p0 = scmp.ne.s32.totalorder %s993_s17, %s989_s16 }
   0x8   : > { %p25_p1 = scmp.eq.s32.totalorder %s24_s23, 0  ;;  %p35_p2 = scmp.eq.s32.totalorder %s997_s18, 0 }
   0x9   : > { %p40_p3 = scmp.ne.s32.totalorder %s989_s16, %s985_s15  ;;  %p41_p4 = scmp.eq.s32.totalorder %s1066_s19, 0 }
   0xa   : > { %s1082_s24 = scalar_select %p25_p1, %s993_s17, %s27_s22  }
   0xb   : > { %p36_p5 = por %p35_p2, %p34_p0  ;;  %p1084_p6 = por %p41_p4, %p40_p3 }
   0xc   : > { %p127_p7 = scmp.eq.s32.totalorder %s1066_s19, 1  ;;  %p133_p8 = scmp.eq.s32.totalorder %s792_s20, 1 }
   0xd   : > { %p837_p10 = scmp.lt.s32.totalorder %s997_s18, 2  ;;  %s162_s28 = sand.u32 1, %s993_s17  }
   0xe   : > { %p1091_p11 = por %p127_p7, %p34_p0  ;;  %p1095_p12 = por %p133_p8, %p40_p3 }
   0xf   : > { %s822_s29 = smul.u32 192, %s997_s18  ;;  %p1106_p13 = pnand %p837_p10, %p36_p5 }
  0x10   : > { %s1356_s26 = scalar_select %p1091_p11, 1, 0 }
  0x11   : > { %s1357_s27 = scalar_select %p1095_p12, 1, 0 }
  0x12   : > { %s821_s30 = smul.u32 12, %s162_s28  ;;  %s1104_s7 = scalar_lea.hbm %s1349_s0, %s822_s29 }
  0x13   : > { %s163_s11 = scalar_lea.sflag [#allocation3], %s162_s28  ;;  %s901_s12 = scalar_lea.hbm %s1104_s7, 192 }
  0x14   : > { %s166_s9 = scalar_lea.vmem [#allocation2], %s821_s30  ;;  %p902_p2 = scmp.ne.s32.totalorder %s1104_s7, %s901_s12 }
  0x15   : > { %s174_s10 = sshll.u32 %s166_s9, 4  ;;  %p903_p3 = pneg %p1106_p13  ;;  %s1111_s10 = int_to_ptr.vmem [resolvable:$true] %s174_s10 }
  0x16   : > { %s906_s20 = scalar_lea.hbm %s1349_s0, 384  ;;  %p907_p7 = scmp.lt.u32.totalorder %s1104_s7, %s1349_s0 }
  0x17   : > { %p904_p4 = pnand %p903_p3, %p902_p2  ;;  %p908_p8 = scmp.lt.u32.totalorder %s906_s20, %s901_s12 }
  0x18   : > { %p910_p9 = scmp.lt.u32.totalorder %s901_s12, %s1104_s7 }
  0x19   : > { %p905_p5 = pneg %p904_p4  ;;  %p909_p10 = por %p908_p8, %p907_p7 }
  0x1b   : > { %p911_p0 = por %p910_p9, %p909_p10 }
  0x1d   : > { %p912_p1 = pnand %p911_p0, %p905_p5 }
  0x1f   : > { %915 = shalt.err (!%p912_p1)
}
  0x20   : > { %s916_s28 = scalar_lea.vmem %s1111_s10, 192  ;;  %s999_s29 = smov [#allocation2]  }
  0x21   : > { %p917_p2 = scmp.ne.s32.totalorder %s1111_s10, %s916_s28  ;;  %s921_s30 = sshll.u32 %s999_s29, 4  ;;  %s922_s30 = int_to_ptr.vmem [resolvable:$false] %s921_s30 }
  0x22   : > { %s923_s5 = scalar_lea.vmem %s922_s30, 384  ;;  %p924_p11 = scmp.lt.s32.totalorder %s1111_s10, %s922_s30 }
  0x23   : > { %p919_p4 = pnand %p917_p2, %p903_p3  ;;  %p925_p7 = scmp.lt.s32.totalorder %s923_s5, %s916_s28 }
  0x25   : > { %p920_p12 = pneg %p919_p4  ;;  %p926_p8 = por %p925_p7, %p924_p11 }
  0x27   : > { %p927_p9 = pnand %p926_p8, %p920_p12 }
  0x29   : > { %930 = shalt.err (!%p927_p9)
}
  0x2a   : > { %832 = dma.hbm_to_vmem [thread:$0]  (!%p1106_p13), %s1104_s7, 192, %s1111_s10, %s163_s11  }
  0x2b   : > { %p1359_p0 = scmp.lt.s32.totalorder %s997_s18, 3  ;;  %p1360_p1 = scmp.ge.s32.totalorder %s997_s18, 1 }
  0x2d   : > { %p180_p3 = pnand %p1360_p1, %p1359_p0 }
  0x2e   : > { %s1144_s6 = sand.u32 (!%p180_p3), 1, %s989_s16  }
  0x2f   : > { %183 = sbr.rel (%p180_p3) target bundleno = 682 (0x2aa), region = 36  ;;  %s186_s12 = scalar_lea.sflag (!%p180_p3), [#allocation3], %s1144_s6 }
  0x30   : > { %s823_s9 = smul.u32 (!%p180_p3), 12, %s1144_s6 }
  0x32   : > { %s189_s8 = scalar_lea.vmem (!%p180_p3), [#allocation2], %s823_s9 }
  0x36   : > { %976 = dma.done.wait (%p1084_p6), %s186_s12, 192  }
  0x37   : > { %978 = vsyncadd (%p1084_p6), %s186_s12, 4294967104  ;;  %v1000_v0 = vmov 0.0   ;;  %vm1001_vm0 = vmmov 0   ;;  %v1002_v1 = vmov 4   ;;  %v1003_v2 = vmov 1   ;;  %v216_v4 = vld [vmem:[%s1350_s1] sm:$0xff] }
  0x38   : > { %811 = vmatprep.subr.mxu1 %v1000_v0  ;;  %813 = vmatprep.mubr.msk.f32.mxu1 %vm1001_vm0, %v1000_v0  ;;  %vm224_vm1 = vcmask 1043456   ;;  %vm220_vm2 = vcmask 31744   ;;  %v215_v3 = vld [vmem:[%s189_s8 + $0x8] sm:$0xf]  ;;  %v214_v5 = vld [vmem:[%s189_s8] sm:$0xff]  ;;  %v1004_v8 = vmov 0   ;;  %v393_v44 = vlaneseq }
  0x39   : > { %295 = vmatprep.mubr.f32.mxu0 %v1000_v0  ;;  %890 = vset.pattern.permute.xlu0 %v1002_v1  ;;  %v219_v6 = vcombine.high %v214_v5, %v214_v5  ;;  %v378_v7 = vld [vmem:[%s1351_s2] sm:$0xff]  ;;  %v1005_v9 = vmov 2   ;;  %v1006_v10 = vmov 8   ;;  %v1007_v11 = vmov 3   ;;  %s1011_s13 = smov 110   ;;  %s1012_s14 = smov 19  }
  0x3a   : > { %892 = vset.pattern.permute.xlu1 %v1003_v2  ;;  %812 = vmatpush3.msk.msra.mxu1 %vm224_vm1, %v215_v3  ;;  %v1008_v12 = vmov 5   ;;  %v1009_v13 = vmov 6   ;;  %v1010_v14 = vmov 7   ;;  %s1013_s20 = smov 18   ;;  %s1014_s22 = smov 17   ;;  %v1213_v47 = vand.u32 127, %v393_v44 }
  0x3b   : > { %814 = vmatmul.mubr.msk.f32.vlgmr.msra.gmra.mrb[0].mxu1 %vm220_vm2, %v216_v4  ;;  %381 = vperm.xlu0 %890, %v378_v7   ;;  %s1015_s23 = smov 1   ;;  %s1016_s28 = smov 127   ;;  %vm556_vm11 = vcmask 64512  }
  0x3c   : > { %797 = vmatprep.subr.msk.mxu0 %vm224_vm1, %v219_v6  ;;  %420 = vperm.xlu1 %892, %v378_v7   ;;  %s1017_s29 = smov 111   ;;  %s1018_s30 = smov 109   ;;  %vm395_vm3 = vcmp.lt.s32.totalorder %v1213_v47, 19  ;;  %vm415_vm4 = vcmp.lt.s32.totalorder %v1213_v47, 18  ;;  %vm435_vm5 = vcmp.lt.s32.totalorder %v1213_v47, 17  ;;  %vm455_vm6 = vcmp.lt.s32.totalorder %v1213_v47, 1 }
  0x3d   : > { %798 = vmatpush1.msk.msra.mxu0 %vm224_vm1, %v214_v5  ;;  %816 = vmatprep.subr.mxu1 %v1000_v0  ;;  %vm475_vm7 = vcmp.lt.s32.totalorder %v1213_v47, 127  ;;  %vm495_vm8 = vcmp.lt.s32.totalorder %v1213_v47, 111  ;;  %vm515_vm9 = vcmp.lt.s32.totalorder %v1213_v47, 110  ;;  %vm535_vm10 = vcmp.lt.s32.totalorder %v1213_v47, 109  ;;  %v555_v47 = vld [vmem:[%s1352_s3] sm:$0xf] }
  0x3e   : > { %799 = vmatmul.mubr.msk.f32.vlgmr.msra.gmra.mrb[0].mxu0 %vm220_vm2, %v216_v4  ;;  %818 = vmatprep.mubr.msk.f32.mxu1 %vm1001_vm0, %v1000_v0  ;;  %s824_s8 = smul.u32 192, %s1066_s19  ;;  %s213_s7 = scalar_lea.vmem [#allocation5], %s823_s9 }
  0x3f   : > { %891 = vset.pattern.permute.xlu0 %v1004_v8  ;;  %624 = vmatprep.mubr.f32.mxu0 %v1000_v0  ;;  %s722_s10 = sshll.u32 %s213_s7, 4  ;;  %s708_s19 = scalar_lea.sflag [#allocation4], %s1144_s6  ;;  %s1302_s10 = int_to_ptr.vmem [resolvable:$true] %s722_s10 }
  0x40   : > { %893 = vset.pattern.permute.xlu1 %v1005_v9  ;;  %400 = vperm.xlu0 %891, %v378_v7   ;;  %s931_s9 = scalar_lea.vmem %s1302_s10, 192  ;;  %p1361_p11 = scmp.ne.s32.totalorder %s1356_s26, 0 }
  0x41   : > { %440 = vperm.xlu1 %893, %v378_v7   ;;  %p932_p6 = scmp.ne.s32.totalorder %s1302_s10, %s931_s9 }
  0x43   : > { %p933_p12 = pnand %p932_p6, %p1361_p11 }
  0x44   : > { %899 = vset.pattern.permute.xlu0 %v1006_v10 }
  0x45   : > { %894 = vset.pattern.permute.xlu1 %v1007_v11  ;;  %p934_p13 = pneg %p933_p12 }
  0x46   : > { %460 = vperm.xlu1 %894, %v378_v7  }
  0x4a   : > { %895 = vset.pattern.permute.xlu1 %v1008_v12 }
  0x4b   : > { %480 = vperm.xlu1 %895, %v378_v7  }
  0x4f   : > { %896 = vset.pattern.permute.xlu1 %v1009_v13 }
  0x50   : > { %500 = vperm.xlu1 %896, %v378_v7  }
  0x54   : > { %897 = vset.pattern.permute.xlu1 %v1010_v14 }
  0x55   : > { %520 = vperm.xlu1 %897, %v378_v7  }
  0x59   : > { %898 = vset.pattern.permute.xlu1 %v1006_v10 }
  0x5a   : > { %540 = vperm.xlu1 %898, %v378_v7  }
  0xba   : > { %v382_v31 = vpop.permute.xlu0 %381 }
  0xbb   : > { %v421_v25 = vpop.permute.xlu1 %420 }
  0xbf   : > { %v401_v33 = vpop.permute.xlu0 %400 }
  0xc0   : > { %v1195_v26 = vpop.permute.xlu1 %440 }
  0xc5   : > { %v1197_v27 = vpop.permute.xlu1 %460 }
  0xca   : > { %v1199_v28 = vpop.permute.xlu1 %480 }
  0xcf   : > { %v1201_v29 = vpop.permute.xlu1 %500 }
  0xd4   : > { %v1203_v30 = vpop.permute.xlu1 %520 }
  0xd9   : > { %v1205_v32 = vpop.permute.xlu1 %540 }
 0x10e   : > { %v368_v15 = vpop.f32.mrb[0].mxu1 }
 0x10f   : > { %v374_v16 = vmax.f32 %v368_v15, 0.0  ;;  %v815_v17 = vpop.f32.mrb[1].mxu1 }
 0x111   : > { %v1162_v18 = vmin.f32 %v374_v16, 6.0  ;;  %v297_v19 = vpop.f32.mrb[0].mxu0 }
 0x112   : > { %v372_v20 = vmax.f32 %v297_v19, 0.0  ;;  %v299_v21 = vpop.f32.mrb[1].mxu0 }
 0x113   : > { %513 = vrot.lane.b32.xlu1 %v1162_v18, %s1011_s13  ;;  %391 = vrot.lane.b32.xlu0 %v1162_v18, %s1012_s14  ;;  %v373_v23 = vmax.f32 %v299_v21, 0.0  ;;  %v386_v3 = vmul.f32 %v382_v31, %v1162_v18 }
 0x114   : > { %v1167_v22 = vmin.f32 %v372_v20, 6.0 }
 0x115   : > { %v1179_v24 = vmin.f32 %v373_v23, 6.0 }
 0x116   : > { %v384_v57 = vmul.f32 %v382_v31, %v1167_v22 }
 0x117   : > { %413 = vrot.lane.b32.xlu0 %v1162_v18, %s1013_s20  ;;  %387 = vrot.lane.b32.xlu1 %v1167_v22, %s1012_s14  ;;  %v385_v9 = vmul.f32 %v382_v31, %v1179_v24 }
 0x11b   : > { %433 = vrot.lane.b32.xlu0 %v1162_v18, %s1014_s22  ;;  %409 = vrot.lane.b32.xlu1 %v1167_v22, %s1013_s20 }
 0x11f   : > { %453 = vrot.lane.b32.xlu0 %v1162_v18, %s1015_s23  ;;  %429 = vrot.lane.b32.xlu1 %v1167_v22, %s1014_s22 }
 0x123   : > { %473 = vrot.lane.b32.xlu0 %v1162_v18, %s1016_s28  ;;  %449 = vrot.lane.b32.xlu1 %v1167_v22, %s1015_s23 }
 0x127   : > { %493 = vrot.lane.b32.xlu0 %v1162_v18, %s1017_s29  ;;  %489 = vrot.lane.b32.xlu1 %v1167_v22, %s1017_s29 }
 0x12b   : > { %469 = vrot.lane.b32.xlu0 %v1167_v22, %s1016_s28  ;;  %471 = vrot.lane.b32.xlu1 %v1179_v24, %s1016_s28 }
 0x12f   : > { %509 = vrot.lane.b32.xlu0 %v1167_v22, %s1011_s13  ;;  %491 = vrot.lane.b32.xlu1 %v1179_v24, %s1017_s29 }
 0x133   : > { %531 = vrot.lane.b32.xlu1 %v1179_v24, %s1018_s30  ;;  %389 = vrot.lane.b32.xlu0 %v1179_v24, %s1012_s14  ;;  %s1019_s14 = smov [#allocation5]  }
 0x137   : > { %529 = vrot.lane.b32.xlu1 %v1167_v22, %s1018_s30  ;;  %411 = vrot.lane.b32.xlu0 %v1179_v24, %s1013_s20  ;;  %s935_s20 = sshll.u32 %s1019_s14, 4  ;;  %s936_s20 = int_to_ptr.vmem [resolvable:$false] %s935_s20 }
 0x138   : > { %p938_p5 = scmp.lt.s32.totalorder %s1302_s10, %s936_s20 }
 0x13b   : > { %431 = vrot.lane.b32.xlu0 %v1179_v24, %s1014_s22  ;;  %s937_s22 = scalar_lea.vmem %s936_s20, 384 }
 0x13c   : > { %p939_p10 = scmp.lt.s32.totalorder %s937_s22, %s931_s9 }
 0x13e   : > { %p940_p2 = por %p939_p10, %p938_p5 }
 0x13f   : > { %451 = vrot.lane.b32.xlu0 %v1179_v24, %s1015_s23 }
 0x140   : > { %p941_p4 = pnand %p940_p2, %p934_p13 }
 0x143   : > { %511 = vrot.lane.b32.xlu0 %v1179_v24, %s1011_s13  ;;  %s1307_s13 = scalar_lea.hbm %s1353_s4, %s824_s8 }
 0x147   : > { %533 = vrot.lane.b32.xlu0 %v1162_v18, %s1018_s30 }
 0x185   : > { %v1207_v34 = vpop.permute.xlu1 %513  ;;  %v392_v35 = vpop.permute.xlu0 %391 }
 0x189   : > { %v414_v36 = vpop.permute.xlu0 %413  ;;  %v388_v37 = vpop.permute.xlu1 %387 }
 0x18a   : > { %v398_v51 = vsel %vm395_vm3, %v392_v35, %v388_v37 }
 0x18b   : > { %v403_v54 = vmul.f32 %v401_v33, %v398_v51 }
 0x18d   : > { %v434_v38 = vpop.permute.xlu0 %433  ;;  %v410_v39 = vpop.permute.xlu1 %409  ;;  %v406_v63 = vadd.f32 %v403_v54, %v384_v57 }
 0x18e   : > { %v418_v52 = vsel %vm415_vm4, %v414_v36, %v410_v39 }
 0x18f   : > { %v423_v58 = vmul.f32 %v421_v25, %v418_v52 }
 0x191   : > { %v1209_v40 = vpop.permute.xlu0 %453  ;;  %v430_v41 = vpop.permute.xlu1 %429  ;;  %v426_v6 = vadd.f32 %v423_v58, %v406_v63 }
 0x192   : > { %v438_v56 = vsel %vm435_vm5, %v434_v38, %v430_v41 }
 0x193   : > { %v443_v0 = vmul.f32 %v1195_v26, %v438_v56 }
 0x195   : > { %v474_v42 = vpop.permute.xlu0 %473  ;;  %v1211_v43 = vpop.permute.xlu1 %449  ;;  %v446_v14 = vadd.f32 %v443_v0, %v426_v6 }
 0x196   : > { %v458_v61 = vsel %vm455_vm6, %v1209_v40, %v1211_v43 }
 0x197   : > { %v463_v7 = vmul.f32 %v1197_v27, %v458_v61 }
 0x199   : > { %v494_v45 = vpop.permute.xlu0 %493  ;;  %v490_v46 = vpop.permute.xlu1 %489  ;;  %v466_v22 = vadd.f32 %v463_v7, %v446_v14 }
 0x19a   : > { %v498_v23 = vsel %vm495_vm8, %v494_v45, %v490_v46 }
 0x19d   : > { %v470_v48 = vpop.permute.xlu0 %469  ;;  %v472_v49 = vpop.permute.xlu1 %471 }
 0x19e   : > { %v477_v10 = vsel %vm475_vm7, %v470_v48, %v472_v49  ;;  %v476_v31 = vsel %vm475_vm7, %v472_v49, %v474_v42 }
 0x19f   : > { %v483_v24 = vmul.f32 %v1199_v28, %v477_v10 }
 0x1a1   : > { %v1216_v50 = vpop.permute.xlu0 %509  ;;  %v492_v55 = vpop.permute.xlu1 %491  ;;  %v486_v51 = vadd.f32 %v483_v24, %v466_v22 }
 0x1a2   : > { %v497_v15 = vsel %vm495_vm8, %v490_v46, %v492_v55 }
 0x1a5   : > { %v390_v53 = vpop.permute.xlu0 %389  ;;  %v532_v8 = vpop.permute.xlu1 %531 }
 0x1a6   : > { %v396_v59 = vsel %vm395_vm3, %v390_v53, %v392_v35  ;;  %v397_v60 = vsel %vm395_vm3, %v388_v37, %v390_v53  ;;  %v503_v37 = vmul.f32 %v1201_v29, %v497_v15 }
 0x1a7   : > { %v404_v4 = vmul.f32 %v401_v33, %v397_v60  ;;  %v405_v5 = vmul.f32 %v401_v33, %v396_v59 }
 0x1a8   : > { %v506_v57 = vadd.f32 %v503_v37, %v486_v51 }
 0x1a9   : > { %v412_v62 = vpop.permute.xlu0 %411  ;;  %v407_v18 = vadd.f32 %v404_v4, %v385_v9  ;;  %v408_v19 = vadd.f32 %v405_v5, %v386_v3 }
 0x1aa   : > { %v416_v1 = vsel %vm415_vm4, %v412_v62, %v414_v36  ;;  %v417_v2 = vsel %vm415_vm4, %v410_v39, %v412_v62 }
 0x1ab   : > { %v424_v11 = vmul.f32 %v421_v25, %v417_v2  ;;  %v425_v12 = vmul.f32 %v421_v25, %v416_v1  ;;  %v478_v25 = vsel %vm475_vm7, %v474_v42, %v470_v48 }
 0x1ac   : > { %v485_v49 = vmul.f32 %v1199_v28, %v478_v25 }
 0x1ad   : > { %v432_v13 = vpop.permute.xlu0 %431  ;;  %v427_v33 = vadd.f32 %v424_v11, %v407_v18  ;;  %v428_v35 = vadd.f32 %v425_v12, %v408_v19 }
 0x1ae   : > { %v436_v16 = vsel %vm435_vm5, %v432_v13, %v434_v38  ;;  %v437_v17 = vsel %vm435_vm5, %v430_v41, %v432_v13  ;;  %v530_v38 = vpop.permute.xlu1 %529 }
 0x1af   : > { %v444_v20 = vmul.f32 %v1195_v26, %v437_v17  ;;  %v445_v21 = vmul.f32 %v1195_v26, %v436_v16  ;;  %v496_v26 = vsel %vm495_vm8, %v492_v55, %v494_v45  ;;  %v484_v45 = vmul.f32 %v1199_v28, %v476_v31 }
 0x1b0   : > { %v537_v52 = vsel %vm535_vm10, %v530_v38, %v532_v8  ;;  %v505_v55 = vmul.f32 %v1201_v29, %v498_v23 }
 0x1b1   : > { %v452_v36 = vpop.permute.xlu0 %451  ;;  %v447_v44 = vadd.f32 %v444_v20, %v427_v33  ;;  %v448_v46 = vadd.f32 %v445_v21, %v428_v35  ;;  %v543_v62 = vmul.f32 %v1205_v32, %v537_v52 }
 0x1b2   : > { %v456_v39 = vsel %vm455_vm6, %v452_v36, %v1209_v40  ;;  %v457_v41 = vsel %vm455_vm6, %v1211_v43, %v452_v36  ;;  %v518_v40 = vsel %vm515_vm9, %v1207_v34, %v1216_v50 }
 0x1b3   : > { %v464_v42 = vmul.f32 %v1197_v27, %v457_v41  ;;  %v465_v48 = vmul.f32 %v1197_v27, %v456_v39  ;;  %v504_v27 = vmul.f32 %v1201_v29, %v496_v26  ;;  %v525_v61 = vmul.f32 %v1203_v30, %v518_v40 }
 0x1b5   : > { %v467_v43 = vadd.f32 %v464_v42, %v447_v44  ;;  %v468_v53 = vadd.f32 %v465_v48, %v448_v46  ;;  %v512_v54 = vpop.permute.xlu0 %511 }
 0x1b6   : > { %v516_v28 = vsel %vm515_vm9, %v512_v54, %v1207_v34  ;;  %v517_v56 = vsel %vm515_vm9, %v1216_v50, %v512_v54 }
 0x1b7   : > { %v487_v58 = vadd.f32 %v484_v45, %v467_v43  ;;  %v488_v59 = vadd.f32 %v485_v49, %v468_v53  ;;  %v523_v60 = vmul.f32 %v1203_v30, %v517_v56  ;;  %v524_v29 = vmul.f32 %v1203_v30, %v516_v28 }
 0x1b9   : > { %v507_v63 = vadd.f32 %v504_v27, %v487_v58  ;;  %v526_v0 = vadd.f32 %v523_v60, %v506_v57  ;;  %v508_v1 = vadd.f32 %v505_v55, %v488_v59  ;;  %v534_v2 = vpop.permute.xlu0 %533 }
 0x1ba   : > { %v536_v34 = vsel %vm535_vm10, %v532_v8, %v534_v2  ;;  %v538_v50 = vsel %vm535_vm10, %v534_v2, %v530_v38 }
 0x1bb   : > { %v527_v3 = vadd.f32 %v524_v29, %v507_v63  ;;  %v546_v4 = vadd.f32 %v543_v62, %v526_v0  ;;  %v528_v5 = vadd.f32 %v525_v61, %v508_v1  ;;  %v544_v6 = vmul.f32 %v1205_v32, %v536_v34 }
 0x1bc   : > { %v545_v7 = vmul.f32 %v1205_v32, %v538_v50 }
 0x1bd   : > { %v547_v9 = vadd.f32 %v544_v6, %v527_v3  ;;  %v549_v30 = vmax.f32 %v546_v4, 0.0 }
 0x1be   : > { %v548_v10 = vadd.f32 %v545_v7, %v528_v5 }
 0x1bf   : > { %v550_v11 = vmax.f32 %v547_v9, 0.0  ;;  %v552_v8 = vmin.f32 %v549_v30, 6.0 }
 0x1c0   : > { %v551_v12 = vmax.f32 %v548_v10, 0.0 }
 0x1c1   : > { %v553_v13 = vmin.f32 %v550_v11, 6.0 }
 0x1c2   : > { %v554_v14 = vmin.f32 %v551_v12, 6.0 }
 0x1c3   : > { %560 = vmatprep.subr.mxu0 %v553_v13 }
 0x1c4   : > { %817 = vmatpush3.msra.mxu1 %v554_v14  ;;  %561 = vmatpush1.msra.mxu0 %v552_v8 }
 0x1c5   : > { %802 = vmatmul.mubr.msk.f32.vlgmr.msra.gmra.mrb[2].mxu0 %vm556_vm11, %v555_v47  ;;  %819 = vmatmul.mubr.msk.f32.vlgmr.msra.gmra.mrb[2].mxu1 %vm556_vm11, %v555_v47 }
 0x298   : > { %v626_v32 = vpop.f32.mrb[2].mxu0  ;;  %v697_v15 = vpop.f32.mrb[2].mxu1 }
 0x299   : > { %v628_v16 = vpop.f32.mrb[3].mxu0  ;;  %706 = vst [vmem:[%s213_s7 + $0x8] sm:$0xf] %v697_v15  ;;  %v820_v17 = vpop.f32.mrb[3].mxu1 }
 0x29a   : > { %v703_v18 = vcombine.low %v626_v32, %v628_v16 }
 0x29c   : > { %705 = vst [vmem:[%s213_s7] sm:$0xff] %v703_v18 }
 0x29d   : > { %944 = shalt.err (!%p941_p4)
}
 0x29e   : > { %s945_s6 = scalar_lea.hbm %s1307_s13, 192  ;;  %s949_s29 = scalar_lea.hbm %s1353_s4, 384 }
 0x29f   : > { %p946_p7 = scmp.ne.s32.totalorder %s1307_s13, %s945_s6  ;;  %p950_p0 = scmp.lt.u32.totalorder %s1307_s13, %s1353_s4 }
 0x2a0   : > { %p951_p1 = scmp.lt.u32.totalorder %s949_s29, %s945_s6  ;;  %p953_p6 = scmp.lt.u32.totalorder %s945_s6, %s1307_s13 }
 0x2a1   : > { %p947_p8 = pnand %p946_p7, %p1361_p11 }
 0x2a2   : > { %p952_p3 = por %p951_p1, %p950_p0 }
 0x2a3   : > { %p948_p9 = pneg %p947_p8 }
 0x2a4   : > { %p954_p12 = por %p953_p6, %p952_p3 }
 0x2a6   : > { %p955_p13 = pnand %p954_p12, %p948_p9 }
 0x2a8   : > { %958 = shalt.err (!%p955_p13)
}
 0x2a9   : > { %827 = dma.vmem_to_hbm [thread:$0]  (%p1361_p11), %s1302_s10, 192, %s1307_s13, %s708_s19  }
 0x2aa PF: > { %s734_s12 = sand.u32 1, %s985_s15   ;;  %p1362_p5 = scmp.ne.s32.totalorder %s1357_s27, 0 }
 0x2ab   : > { %p1363_p10 = scmp.ge.s32.totalorder %s997_s18, 2  ;;  %s735_s8 = scalar_lea.sflag [#allocation4], %s734_s12 }
 0x2ad   : > { %p834_p2 = pnand %p1363_p10, %p1362_p5 }
 0x2af   : > { %980 = dma.done.wait (!%p834_p2), %s735_s8, 192  }
 0x2b0   : > { %982 = vsyncadd (!%p834_p2), %s735_s8, 4294967104  ;;  %p17_p4 = scmp.ge.s32.totalorder %s1070_s21, 4   ;;  %s1364_s15 = smov %s989_s16 }
 0x2b1   : > { %s1365_s16 = smov %s993_s17  ;;  %s1366_s17 = smov %s1082_s24 }
 0x2b2   : > { %s1367_s18 = smov %s1070_s21  ;;  %19 = sbr.rel (!%p17_p4) target bundleno = 5 (0x5), region = 81 }
 0x2b9   :  { %740 = vsyncpa [#allocation3], 1 }
 0x2ba   :  { %742 = vsyncpa [#allocation3 + $0x1], 1 }
 0x2bb   :  { %743 = vsyncpa [#allocation4], 1 }
 0x2bc   :  { %745 = vsyncpa [#allocation4 + $0x1], 1 }

</bundles_post_ra>
